<compile_context>
chip_gen: v6e
topology: v6e:2x2x1
jax: 0.10.0
libtpu: 0.0.40
codegen_flags: <defaults>
</compile_context>

<pallas_src>
import functools

import jax
import jax.numpy as jnp
from jax.experimental import pallas as pl
from jax.experimental.pallas import tpu as pltpu

LANES = 128       # padded feature width (lane-aligned)
SUBLANES = 8      # f32 sublane granularity


def _round_up(n: int, m: int) -> int:
    return ((n + m - 1) // m) * m


def _pad_to(a, shape):
    pads = tuple((0, t - s) for s, t in zip(a.shape, shape))
    if any(p[1] for p in pads):
        a = jnp.pad(a, pads)
    return a


def mlp_kernel(x_ref,
               w1_ref, b1_ref, w2_ref, b2_ref, w3_ref, b3_ref,
               w4_ref, b4_ref, w5_ref, b5_ref,
               o_ref):
    """Fused 5-layer MLP forward on one batch tile.

    Activations stay in vregs between layers; weights are VMEM-resident across
    grid steps (constant index_map). All feature dims are padded to 128 lanes,
    so the output store is lane-dense.
    """
    h = x_ref[...]  # (TB, K_in) f32 -- input is already f32, no cast pass
    h = jnp.maximum(
        jnp.dot(h, w1_ref[...], preferred_element_type=jnp.float32) + b1_ref[...], 0.0)
    h = jnp.maximum(
        jnp.dot(h, w2_ref[...], preferred_element_type=jnp.float32) + b2_ref[...], 0.0)
    h = jnp.maximum(
        jnp.dot(h, w3_ref[...], preferred_element_type=jnp.float32) + b3_ref[...], 0.0)
    h = jnp.maximum(
        jnp.dot(h, w4_ref[...], preferred_element_type=jnp.float32) + b4_ref[...], 0.0)
    z = jnp.dot(h, w5_ref[...], preferred_element_type=jnp.float32) + b5_ref[...]
    # sigmoid(z) = 1 / (1 + exp(-z)); exp and approx reciprocal both issue on
    # the EUP slot, keeping the epilogue off the VALU critical path.
    o_ref[...] = pl.reciprocal(1.0 + jnp.exp(-z), approx=True)


@functools.partial(jax.jit, static_argnames=("block_batch",))
def my_neural_net_forward(x, params, *, block_batch=512):
    """Forward pass. x: (B, D_in) f32; params: (w1,b1,...,w5,b5), wi (in,out), bi (1,out).

    Returns (B, 1) sigmoid probabilities, matching the PyTorch module.
    """
    w1, b1, w2, b2, w3, b3, w4, b4, w5, b5 = params
    B, d_in = x.shape
    f = LANES
    k_in = _round_up(d_in, SUBLANES)

    # One-time zero padding of weights/biases to lane/sublane-aligned shapes.
    # Zero padding preserves results exactly: padded hidden lanes stay 0
    # through ReLU, and padded output lanes/rows are sliced off below.
    w1p = _pad_to(w1, (k_in, f)); b1p = _pad_to(b1, (1, f))
    w2p = _pad_to(w2, (f, f));    b2p = _pad_to(b2, (1, f))
    w3p = _pad_to(w3, (f, f));    b3p = _pad_to(b3, (1, f))
    w4p = _pad_to(w4, (f, f));    b4p = _pad_to(b4, (1, f))
    w5p = _pad_to(w5, (f, f));    b5p = _pad_to(b5, (1, f))

    # Batch tiling: TB rows per grid step, batch padded to a multiple of TB.
    tb = min(block_batch, _round_up(B, SUBLANES))
    b_pad = _round_up(B, tb)
    xp = _pad_to(x.astype(jnp.float32), (b_pad, k_in))
    grid = (b_pad // tb,)

    resident = lambda shape: pl.BlockSpec(shape, lambda i: (0, 0))
    in_specs = [
        pl.BlockSpec((tb, k_in), lambda i: (i, 0)),   # x: tiled over batch
        resident((k_in, f)), resident((1, f)),        # layer 1
        resident((f, f)),    resident((1, f)),        # layer 2
        resident((f, f)),    resident((1, f)),        # layer 3
        resident((f, f)),    resident((1, f)),        # layer 4
        resident((f, f)),    resident((1, f)),        # layer 5
    ]
    out_specs = pl.BlockSpec((tb, f), lambda i: (i, 0))  # lane-dense output slab

    param_bytes = sum(p.size * 4 for p in
                      (w1p, b1p, w2p, b2p, w3p, b3p, w4p, b4p, w5p, b5p))
    cost = pl.CostEstimate(
        flops=2 * b_pad * (k_in * f + 4 * f * f),
        transcendentals=b_pad * f,
        bytes_accessed=(xp.size + b_pad * f) * 4 + param_bytes,
    )

    out_padded = pl.pallas_call(
        mlp_kernel,
        out_shape=jax.ShapeDtypeStruct((b_pad, f), jnp.float32),
        grid=grid,
        in_specs=in_specs,
        out_specs=out_specs,
        compiler_params=pltpu.CompilerParams(
            dimension_semantics=("parallel",),        # megacore-shard batch tiles (v7x)
            vmem_limit_bytes=32 * 1024 * 1024,
        ),
        cost_estimate=cost,
    )(xp, w1p, b1p, w2p, b2p, w3p, b3p, w4p, b4p, w5p, b5p)

    # Column 0 holds the real sigmoid output; padded lanes/rows are dropped.
    return out_padded[:B, :1]


def init_params(key, x_dim, num_features=20):
    """Deterministic init mimicking PyTorch nn.Linear default (uniform +/- 1/sqrt(fan_in))."""
    dims = [(x_dim, num_features),
            (num_features, num_features),
            (num_features, num_features),
            (num_features, num_features),
            (num_features, 1)]
    params = []
    for (fan_in, fan_out) in dims:
        key, kw, kb = jax.random.split(key, 3)
        bound = 1.0 / jnp.sqrt(jnp.float32(fan_in))
        w = jax.random.uniform(kw, (fan_in, fan_out), jnp.float32, -bound, bound)
        b = jax.random.uniform(kb, (1, fan_out), jnp.float32, -bound, bound)
        params.extend([w, b])
    return tuple(params)


def reference_forward(x, params):
    """Pure-JAX reference for correctness checking."""
    w1, b1, w2, b2, w3, b3, w4, b4, w5, b5 = params
    h = jnp.maximum(x @ w1 + b1, 0.0)
    h = jnp.maximum(h @ w2 + b2, 0.0)
    h = jnp.maximum(h @ w3 + b3, 0.0)
    h = jnp.maximum(h @ w4 + b4, 0.0)
    return jax.nn.sigmoid(h @ w5 + b5)


# TODO(synk): only forward() is implemented; training (fit/BCELoss/Adam) and the
# predict/score helpers are host-side logic outside the kernel's scope.

if __name__ == "__main__":
    key = jax.random.PRNGKey(0)
    k_x, k_p, k_x2 = jax.random.split(key, 3)

    # Small shapes consistent with the module: X is (batch, X_dim); layer_1 is
    # nn.Linear(X.shape[1], 20).
    batch, x_dim = 8, 16
    x = jax.random.normal(k_x, (batch, x_dim), jnp.float32)
    params = init_params(k_p, x_dim, num_features=20)

    out = jax.block_until_ready(my_neural_net_forward(x, params))
    ref = reference_forward(x, params)
    assert out.shape == (batch, 1)
    assert jnp.allclose(out, ref, atol=2e-3, rtol=2e-3), "mismatch vs reference (small batch)"

    # Exercise a multi-step grid + ragged batch padding (4 tiles of 64 for B=200).
    batch2 = 200
    x2 = jax.random.normal(k_x2, (batch2, x_dim), jnp.float32)
    out2 = jax.block_until_ready(my_neural_net_forward(x2, params, block_batch=64))
    ref2 = reference_forward(x2, params)
    assert out2.shape == (batch2, 1)
    assert jnp.allclose(out2, ref2, atol=2e-3, rtol=2e-3), "mismatch vs reference (gridded batch)"

    print("KERNEL_OK")
</pallas_src>

<mosaic_0001>
module attributes {stable_mosaic.version = 11 : i64} {
  func.func @mlp_kernel(%arg0: i32, %arg1: memref<8x16xf32, #tpu.memory_space<vmem>>, %arg2: memref<16x128xf32, #tpu.memory_space<vmem>>, %arg3: memref<1x128xf32, #tpu.memory_space<vmem>>, %arg4: memref<128x128xf32, #tpu.memory_space<vmem>>, %arg5: memref<1x128xf32, #tpu.memory_space<vmem>>, %arg6: memref<128x128xf32, #tpu.memory_space<vmem>>, %arg7: memref<1x128xf32, #tpu.memory_space<vmem>>, %arg8: memref<128x128xf32, #tpu.memory_space<vmem>>, %arg9: memref<1x128xf32, #tpu.memory_space<vmem>>, %arg10: memref<128x128xf32, #tpu.memory_space<vmem>>, %arg11: memref<1x128xf32, #tpu.memory_space<vmem>>, %arg12: memref<8x128xf32, #tpu.memory_space<vmem>>) attributes {dimension_semantics = [#tpu.dimension_semantics<parallel>], iteration_bounds = array<i64: 1>, scalar_prefetch = 0 : i64, scratch_operands = 0 : i64, tpu.core_type = #tpu.core_type<tc>, window_params = [{transform_indices = @transform_0, window_bounds = array<i64: 8, 16>}, {pipeline_mode = #tpu.pipeline_mode<synchronous>, transform_indices = @transform_1, window_bounds = array<i64: 16, 128>}, {pipeline_mode = #tpu.pipeline_mode<synchronous>, transform_indices = @transform_2, window_bounds = array<i64: 1, 128>}, {pipeline_mode = #tpu.pipeline_mode<synchronous>, transform_indices = @transform_3, window_bounds = array<i64: 128, 128>}, {pipeline_mode = #tpu.pipeline_mode<synchronous>, transform_indices = @transform_4, window_bounds = array<i64: 1, 128>}, {pipeline_mode = #tpu.pipeline_mode<synchronous>, transform_indices = @transform_5, window_bounds = array<i64: 128, 128>}, {pipeline_mode = #tpu.pipeline_mode<synchronous>, transform_indices = @transform_6, window_bounds = array<i64: 1, 128>}, {pipeline_mode = #tpu.pipeline_mode<synchronous>, transform_indices = @transform_7, window_bounds = array<i64: 128, 128>}, {pipeline_mode = #tpu.pipeline_mode<synchronous>, transform_indices = @transform_8, window_bounds = array<i64: 1, 128>}, {pipeline_mode = #tpu.pipeline_mode<synchronous>, transform_indices = @transform_9, window_bounds = array<i64: 128, 128>}, {pipeline_mode = #tpu.pipeline_mode<synchronous>, transform_indices = @transform_10, window_bounds = array<i64: 1, 128>}, {transform_indices = @transform_11, window_bounds = array<i64: 8, 128>}]} {
    %c0 = arith.constant 0 : index
    %c0_0 = arith.constant 0 : index
    %0 = vector.load %arg1[%c0, %c0_0] : memref<8x16xf32, #tpu.memory_space<vmem>>, vector<8x16xf32>
    %c0_1 = arith.constant 0 : index
    %c0_2 = arith.constant 0 : index
    %1 = vector.load %arg2[%c0_1, %c0_2] : memref<16x128xf32, #tpu.memory_space<vmem>>, vector<16x128xf32>
    %cst = arith.constant dense<0.000000e+00> : vector<8x128xf32>
    %2 = tpu.matmul %0, %1, %cst {dimension_numbers = #tpu.dot_dimension_numbers<[1], [0], [0], [1], [0, 0, 1, 1], [], []>} : vector<8x16xf32>, vector<16x128xf32>, vector<8x128xf32> -> vector<8x128xf32>
    %c0_3 = arith.constant 0 : index
    %c0_4 = arith.constant 0 : index
    %3 = vector.load %arg3[%c0_3, %c0_4] : memref<1x128xf32, #tpu.memory_space<vmem>>, vector<1x128xf32>
    %4 = vector.broadcast %3 : vector<1x128xf32> to vector<8x128xf32>
    %5 = arith.addf %2, %4 : vector<8x128xf32>
    %cst_5 = arith.constant 0.000000e+00 : f32
    %6 = vector.broadcast %cst_5 : f32 to vector<8x128xf32>
    %7 = arith.maximumf %5, %6 : vector<8x128xf32>
    %c0_6 = arith.constant 0 : index
    %c0_7 = arith.constant 0 : index
    %8 = vector.load %arg4[%c0_6, %c0_7] : memref<128x128xf32, #tpu.memory_space<vmem>>, vector<128x128xf32>
    %cst_8 = arith.constant dense<0.000000e+00> : vector<8x128xf32>
    %9 = tpu.matmul %7, %8, %cst_8 {dimension_numbers = #tpu.dot_dimension_numbers<[1], [0], [0], [1], [0, 0, 1, 1], [], []>} : vector<8x128xf32>, vector<128x128xf32>, vector<8x128xf32> -> vector<8x128xf32>
    %c0_9 = arith.constant 0 : index
    %c0_10 = arith.constant 0 : index
    %10 = vector.load %arg5[%c0_9, %c0_10] : memref<1x128xf32, #tpu.memory_space<vmem>>, vector<1x128xf32>
    %11 = vector.broadcast %10 : vector<1x128xf32> to vector<8x128xf32>
    %12 = arith.addf %9, %11 : vector<8x128xf32>
    %cst_11 = arith.constant 0.000000e+00 : f32
    %13 = vector.broadcast %cst_11 : f32 to vector<8x128xf32>
    %14 = arith.maximumf %12, %13 : vector<8x128xf32>
    %c0_12 = arith.constant 0 : index
    %c0_13 = arith.constant 0 : index
    %15 = vector.load %arg6[%c0_12, %c0_13] : memref<128x128xf32, #tpu.memory_space<vmem>>, vector<128x128xf32>
    %cst_14 = arith.constant dense<0.000000e+00> : vector<8x128xf32>
    %16 = tpu.matmul %14, %15, %cst_14 {dimension_numbers = #tpu.dot_dimension_numbers<[1], [0], [0], [1], [0, 0, 1, 1], [], []>} : vector<8x128xf32>, vector<128x128xf32>, vector<8x128xf32> -> vector<8x128xf32>
    %c0_15 = arith.constant 0 : index
    %c0_16 = arith.constant 0 : index
    %17 = vector.load %arg7[%c0_15, %c0_16] : memref<1x128xf32, #tpu.memory_space<vmem>>, vector<1x128xf32>
    %18 = vector.broadcast %17 : vector<1x128xf32> to vector<8x128xf32>
    %19 = arith.addf %16, %18 : vector<8x128xf32>
    %cst_17 = arith.constant 0.000000e+00 : f32
    %20 = vector.broadcast %cst_17 : f32 to vector<8x128xf32>
    %21 = arith.maximumf %19, %20 : vector<8x128xf32>
    %c0_18 = arith.constant 0 : index
    %c0_19 = arith.constant 0 : index
    %22 = vector.load %arg8[%c0_18, %c0_19] : memref<128x128xf32, #tpu.memory_space<vmem>>, vector<128x128xf32>
    %cst_20 = arith.constant dense<0.000000e+00> : vector<8x128xf32>
    %23 = tpu.matmul %21, %22, %cst_20 {dimension_numbers = #tpu.dot_dimension_numbers<[1], [0], [0], [1], [0, 0, 1, 1], [], []>} : vector<8x128xf32>, vector<128x128xf32>, vector<8x128xf32> -> vector<8x128xf32>
    %c0_21 = arith.constant 0 : index
    %c0_22 = arith.constant 0 : index
    %24 = vector.load %arg9[%c0_21, %c0_22] : memref<1x128xf32, #tpu.memory_space<vmem>>, vector<1x128xf32>
    %25 = vector.broadcast %24 : vector<1x128xf32> to vector<8x128xf32>
    %26 = arith.addf %23, %25 : vector<8x128xf32>
    %cst_23 = arith.constant 0.000000e+00 : f32
    %27 = vector.broadcast %cst_23 : f32 to vector<8x128xf32>
    %28 = arith.maximumf %26, %27 : vector<8x128xf32>
    %c0_24 = arith.constant 0 : index
    %c0_25 = arith.constant 0 : index
    %29 = vector.load %arg10[%c0_24, %c0_25] : memref<128x128xf32, #tpu.memory_space<vmem>>, vector<128x128xf32>
    %cst_26 = arith.constant dense<0.000000e+00> : vector<8x128xf32>
    %30 = tpu.matmul %28, %29, %cst_26 {dimension_numbers = #tpu.dot_dimension_numbers<[1], [0], [0], [1], [0, 0, 1, 1], [], []>} : vector<8x128xf32>, vector<128x128xf32>, vector<8x128xf32> -> vector<8x128xf32>
    %c0_27 = arith.constant 0 : index
    %c0_28 = arith.constant 0 : index
    %31 = vector.load %arg11[%c0_27, %c0_28] : memref<1x128xf32, #tpu.memory_space<vmem>>, vector<1x128xf32>
    %32 = vector.broadcast %31 : vector<1x128xf32> to vector<8x128xf32>
    %33 = arith.addf %30, %32 : vector<8x128xf32>
    %cst_29 = arith.constant 0.000000e+00 : f32
    %34 = vector.broadcast %cst_29 : f32 to vector<8x128xf32>
    %35 = arith.subf %34, %33 : vector<8x128xf32>
    %36 = math.exp %35 : vector<8x128xf32>
    %cst_30 = arith.constant 1.000000e+00 : f32
    %37 = vector.broadcast %cst_30 : f32 to vector<8x128xf32>
    %38 = arith.addf %37, %36 : vector<8x128xf32>
    %39 = tpu.reciprocal %38 {approx = true} : vector<8x128xf32> -> vector<8x128xf32>
    %c0_31 = arith.constant 0 : index
    %c0_32 = arith.constant 0 : index
    %40 = vector.load %arg12[%c0_31, %c0_32] : memref<8x128xf32, #tpu.memory_space<vmem>>, vector<8x128xf32>
    tpu.vector_store %arg12[%c0_31, %c0_32], %39 {strides = array<i32>} : memref<8x128xf32, #tpu.memory_space<vmem>>, vector<8x128xf32>,
    return
  }
  func.func @transform_0(%arg0: i32) -> (i32, i32) {
    %c0_i32 = arith.constant 0 : i32
    %c0_i32_0 = arith.constant 0 : i32
    return %arg0, %c0_i32 : i32, i32
  }
  func.func @transform_1(%arg0: i32) -> (i32, i32) {
    %c0_i32 = arith.constant 0 : i32
    %c0_i32_0 = arith.constant 0 : i32
    %c0_i32_1 = arith.constant 0 : i32
    return %c0_i32, %c0_i32_0 : i32, i32
  }
  func.func @transform_2(%arg0: i32) -> (i32, i32) {
    %c0_i32 = arith.constant 0 : i32
    %c0_i32_0 = arith.constant 0 : i32
    %c0_i32_1 = arith.constant 0 : i32
    return %c0_i32, %c0_i32_0 : i32, i32
  }
  func.func @transform_3(%arg0: i32) -> (i32, i32) {
    %c0_i32 = arith.constant 0 : i32
    %c0_i32_0 = arith.constant 0 : i32
    %c0_i32_1 = arith.constant 0 : i32
    return %c0_i32, %c0_i32_0 : i32, i32
  }
  func.func @transform_4(%arg0: i32) -> (i32, i32) {
    %c0_i32 = arith.constant 0 : i32
    %c0_i32_0 = arith.constant 0 : i32
    %c0_i32_1 = arith.constant 0 : i32
    return %c0_i32, %c0_i32_0 : i32, i32
  }
  func.func @transform_5(%arg0: i32) -> (i32, i32) {
    %c0_i32 = arith.constant 0 : i32
    %c0_i32_0 = arith.constant 0 : i32
    %c0_i32_1 = arith.constant 0 : i32
    return %c0_i32, %c0_i32_0 : i32, i32
  }
  func.func @transform_6(%arg0: i32) -> (i32, i32) {
    %c0_i32 = arith.constant 0 : i32
    %c0_i32_0 = arith.constant 0 : i32
    %c0_i32_1 = arith.constant 0 : i32
    return %c0_i32, %c0_i32_0 : i32, i32
  }
  func.func @transform_7(%arg0: i32) -> (i32, i32) {
    %c0_i32 = arith.constant 0 : i32
    %c0_i32_0 = arith.constant 0 : i32
    %c0_i32_1 = arith.constant 0 : i32
    return %c0_i32, %c0_i32_0 : i32, i32
  }
  func.func @transform_8(%arg0: i32) -> (i32, i32) {
    %c0_i32 = arith.constant 0 : i32
    %c0_i32_0 = arith.constant 0 : i32
    %c0_i32_1 = arith.constant 0 : i32
    return %c0_i32, %c0_i32_0 : i32, i32
  }
  func.func @transform_9(%arg0: i32) -> (i32, i32) {
    %c0_i32 = arith.constant 0 : i32
    %c0_i32_0 = arith.constant 0 : i32
    %c0_i32_1 = arith.constant 0 : i32
    return %c0_i32, %c0_i32_0 : i32, i32
  }
  func.func @transform_10(%arg0: i32) -> (i32, i32) {
    %c0_i32 = arith.constant 0 : i32
    %c0_i32_0 = arith.constant 0 : i32
    %c0_i32_1 = arith.constant 0 : i32
    return %c0_i32, %c0_i32_0 : i32, i32
  }
  func.func @transform_11(%arg0: i32) -> (i32, i32) {
    %c0_i32 = arith.constant 0 : i32
    %c0_i32_0 = arith.constant 0 : i32
    return %arg0, %c0_i32 : i32, i32
  }
}

</mosaic_0001>

<bundles_post_ra>
// kernel: my_neural_net_forward.1
= control target key start
LH: loop header
LB: loop body
LE: loop exit
PB: predicated region body
PF: predicated region fallthrough
CT: control target
= control target key end

     0   :  { %v738_v0 = vmov 0.0   ;;  %vm739_vm0 = vmmov 0   ;;  %vm48_vm1 = vcmask 130048   ;;  %s1095_s1 = inlined_call_operand.vmem [shape: f32[16,128], index: 1, kind: input, shape index: {}]   ;;  %s1096_s0 = inlined_call_operand.vmem [shape: f32[8,16], index: 0, kind: input, shape index: {}]   ;;  %s1097_s3 = inlined_call_operand.vmem [shape: f32[128,128], index: 3, kind: input, shape index: {}]   ;;  %s1098_s5 = inlined_call_operand.vmem [shape: f32[128,128], index: 5, kind: input, shape index: {}]   ;;  %s1099_s2 = inlined_call_operand.vmem [shape: f32[1,128], index: 2, kind: input, shape index: {}]   ;;  %s1100_s7 = inlined_call_operand.vmem [shape: f32[128,128], index: 7, kind: input, shape index: {}]   ;;  %s1101_s4 = inlined_call_operand.vmem [shape: f32[1,128], index: 4, kind: input, shape index: {}]   ;;  %s1102_s9 = inlined_call_operand.vmem [shape: f32[128,128], index: 9, kind: input, shape index: {}]   ;;  %s1103_s6 = inlined_call_operand.vmem [shape: f32[1,128], index: 6, kind: input, shape index: {}]   ;;  %s1104_s8 = inlined_call_operand.vmem [shape: f32[1,128], index: 8, kind: input, shape index: {}]   ;;  %s1105_s10 = inlined_call_operand.vmem [shape: f32[1,128], index: 10, kind: input, shape index: {}]   ;;  %s1106_s11 = inlined_call_operand.vmem [shape: f32[8,128], index: 11, kind: output, shape index: {}]  }
   0x1   :  { %585 = vmatprep.subr.mxu0 %v738_v0  ;;  %v40_v1 = vld [vmem:[%s1095_s1 + $0x8] sm:$0xff]  ;;  %v39_v2 = vld [vmem:[%s1095_s1] sm:$0xff]  ;;  %589 = vmatprep.mubr.msk.f32.mxu0 %vm739_vm0, %v738_v0  ;;  %v138_v4 = vld [vmem:[%s1097_s3 + $0x78] sm:$0xff] }
   0x2   :  { %586 = vmatpush3.msra.mxu0 %v40_v1  ;;  %v38_v3 = vld [vmem:[%s1096_s0] sm:$0xff]  ;;  %592 = vmatprep.subr.mxu1 %v738_v0  ;;  %v137_v5 = vld [vmem:[%s1097_s3 + $0x70] sm:$0xff]  ;;  %v136_v6 = vld [vmem:[%s1097_s3 + $0x68] sm:$0xff] }
   0x3   :  { %587 = vmatprep.subr.mxu0 %v738_v0  ;;  %593 = vmatpush3.msra.mxu1 %v138_v4  ;;  %v135_v7 = vld [vmem:[%s1097_s3 + $0x60] sm:$0xff]  ;;  %v134_v8 = vld [vmem:[%s1097_s3 + $0x58] sm:$0xff]  ;;  %v133_v9 = vld [vmem:[%s1097_s3 + $0x50] sm:$0xff] }
   0x4   :  { %588 = vmatpush3.msra.mxu0 %v39_v2  ;;  %594 = vmatprep.subr.mxu1 %v738_v0  ;;  %v132_v10 = vld [vmem:[%s1097_s3 + $0x48] sm:$0xff]  ;;  %v131_v11 = vld [vmem:[%s1097_s3 + $0x40] sm:$0xff]  ;;  %v130_v12 = vld [vmem:[%s1097_s3 + $0x38] sm:$0xff] }
   0x5   :  { %590 = vmatmul.mubr.msk.f32.vlgmr.msra.gmra.mxu0 %vm48_vm1, %v38_v3  ;;  %595 = vmatpush3.msra.mxu1 %v137_v5  ;;  %v129_v13 = vld [vmem:[%s1097_s3 + $0x30] sm:$0xff]  ;;  %v128_v14 = vld [vmem:[%s1097_s3 + $0x28] sm:$0xff]  ;;  %v127_v15 = vld [vmem:[%s1097_s3 + $0x20] sm:$0xff] }
   0x6   :  { %596 = vmatprep.subr.mxu1 %v738_v0  ;;  %624 = vmatprep.mubr.msk.f32.mxu1 %vm739_vm0, %v738_v0  ;;  %v126_v16 = vld [vmem:[%s1097_s3 + $0x18] sm:$0xff]  ;;  %v125_v17 = vld [vmem:[%s1097_s3 + $0x10] sm:$0xff]  ;;  %v124_v18 = vld [vmem:[%s1097_s3 + $0x8] sm:$0xff] }
   0x7   :  { %597 = vmatpush3.msra.mxu1 %v136_v6  ;;  %627 = vmatprep.subr.mxu0 %v738_v0  ;;  %v123_v19 = vld [vmem:[%s1097_s3] sm:$0xff]  ;;  %v232_v20 = vld [vmem:[%s1098_s5 + $0x78] sm:$0xff]  ;;  %v231_v21 = vld [vmem:[%s1098_s5 + $0x70] sm:$0xff] }
   0x8   :  { %598 = vmatprep.subr.mxu1 %v738_v0  ;;  %659 = vmatprep.mubr.msk.f32.mxu0 %vm739_vm0, %v738_v0  ;;  %v230_v22 = vld [vmem:[%s1098_s5 + $0x68] sm:$0xff]  ;;  %v229_v23 = vld [vmem:[%s1098_s5 + $0x60] sm:$0xff]  ;;  %v228_v24 = vld [vmem:[%s1098_s5 + $0x58] sm:$0xff] }
   0x9   :  { %599 = vmatpush3.msra.mxu1 %v135_v7  ;;  %628 = vmatpush3.msra.mxu0 %v232_v20  ;;  %v227_v25 = vld [vmem:[%s1098_s5 + $0x50] sm:$0xff]  ;;  %v226_v26 = vld [vmem:[%s1098_s5 + $0x48] sm:$0xff]  ;;  %v225_v27 = vld [vmem:[%s1098_s5 + $0x40] sm:$0xff] }
   0xa   :  { %600 = vmatprep.subr.mxu1 %v738_v0  ;;  %629 = vmatprep.subr.mxu0 %v738_v0  ;;  %v224_v28 = vld [vmem:[%s1098_s5 + $0x38] sm:$0xff]  ;;  %v223_v29 = vld [vmem:[%s1098_s5 + $0x30] sm:$0xff]  ;;  %v222_v30 = vld [vmem:[%s1098_s5 + $0x28] sm:$0xff] }
   0xb   :  { %601 = vmatpush3.msra.mxu1 %v134_v8  ;;  %630 = vmatpush3.msra.mxu0 %v231_v21  ;;  %v221_v31 = vld [vmem:[%s1098_s5 + $0x20] sm:$0xff]  ;;  %v220_v32 = vld [vmem:[%s1098_s5 + $0x18] sm:$0xff]  ;;  %v219_v38 = vld [vmem:[%s1098_s5 + $0x10] sm:$0xff] }
   0xc   :  { %602 = vmatprep.subr.mxu1 %v738_v0  ;;  %631 = vmatprep.subr.mxu0 %v738_v0  ;;  %v508_v33 = vld [vmem:[%s1099_s2] ss:$0 sm:$0xff]  ;;  %v218_v39 = vld [vmem:[%s1098_s5 + $0x8] sm:$0xff]  ;;  %v326_v41 = vld [vmem:[%s1100_s7 + $0x78] sm:$0xff] }
   0xd   :  { %603 = vmatpush3.msra.mxu1 %v133_v9  ;;  %632 = vmatpush3.msra.mxu0 %v230_v22  ;;  %v217_v40 = vld [vmem:[%s1098_s5] sm:$0xff]  ;;  %v325_v42 = vld [vmem:[%s1100_s7 + $0x70] sm:$0xff]  ;;  %v324_v43 = vld [vmem:[%s1100_s7 + $0x68] sm:$0xff] }
   0xe   :  { %604 = vmatprep.subr.mxu1 %v738_v0  ;;  %633 = vmatprep.subr.mxu0 %v738_v0  ;;  %v323_v44 = vld [vmem:[%s1100_s7 + $0x60] sm:$0xff]  ;;  %v322_v45 = vld [vmem:[%s1100_s7 + $0x58] sm:$0xff]  ;;  %v321_v46 = vld [vmem:[%s1100_s7 + $0x50] sm:$0xff] }
   0xf   :  { %605 = vmatpush3.msra.mxu1 %v132_v10  ;;  %634 = vmatpush3.msra.mxu0 %v229_v23  ;;  %v320_v47 = vld [vmem:[%s1100_s7 + $0x48] sm:$0xff]  ;;  %v319_v48 = vld [vmem:[%s1100_s7 + $0x40] sm:$0xff]  ;;  %v318_v49 = vld [vmem:[%s1100_s7 + $0x38] sm:$0xff] }
  0x10   :  { %606 = vmatprep.subr.mxu1 %v738_v0  ;;  %635 = vmatprep.subr.mxu0 %v738_v0  ;;  %v317_v50 = vld [vmem:[%s1100_s7 + $0x30] sm:$0xff]  ;;  %v316_v51 = vld [vmem:[%s1100_s7 + $0x28] sm:$0xff]  ;;  %v315_v52 = vld [vmem:[%s1100_s7 + $0x20] sm:$0xff] }
  0x11   :  { %607 = vmatpush3.msra.mxu1 %v131_v11  ;;  %636 = vmatpush3.msra.mxu0 %v228_v24  ;;  %v314_v53 = vld [vmem:[%s1100_s7 + $0x18] sm:$0xff]  ;;  %v510_v54 = vld [vmem:[%s1101_s4] ss:$0 sm:$0xff]  ;;  %v313_v59 = vld [vmem:[%s1100_s7 + $0x10] sm:$0xff] }
  0x12   :  { %608 = vmatprep.subr.mxu1 %v738_v0  ;;  %637 = vmatprep.subr.mxu0 %v738_v0  ;;  %v312_v60 = vld [vmem:[%s1100_s7 + $0x8] sm:$0xff]  ;;  %v311_v61 = vld [vmem:[%s1100_s7] sm:$0xff]  ;;  %v420_v62 = vld [vmem:[%s1102_s9 + $0x78] sm:$0xff] }
  0x13   :  { %609 = vmatpush3.msra.mxu1 %v130_v12  ;;  %638 = vmatpush3.msra.mxu0 %v227_v25  ;;  %v419_v63 = vld [vmem:[%s1102_s9 + $0x70] sm:$0xff]  ;;  %v418_v1 = vld [vmem:[%s1102_s9 + $0x68] sm:$0xff]  ;;  %v417_v2 = vld [vmem:[%s1102_s9 + $0x60] sm:$0xff] }
  0x14   :  { %610 = vmatprep.subr.mxu1 %v738_v0  ;;  %639 = vmatprep.subr.mxu0 %v738_v0  ;;  %v416_v3 = vld [vmem:[%s1102_s9 + $0x58] sm:$0xff]  ;;  %v415_v4 = vld [vmem:[%s1102_s9 + $0x50] sm:$0xff]  ;;  %v414_v5 = vld [vmem:[%s1102_s9 + $0x48] sm:$0xff] }
  0x15   :  { %611 = vmatpush3.msra.mxu1 %v129_v13  ;;  %640 = vmatpush3.msra.mxu0 %v226_v26  ;;  %v413_v6 = vld [vmem:[%s1102_s9 + $0x40] sm:$0xff]  ;;  %v412_v7 = vld [vmem:[%s1102_s9 + $0x38] sm:$0xff]  ;;  %v411_v8 = vld [vmem:[%s1102_s9 + $0x30] sm:$0xff] }
  0x16   :  { %612 = vmatprep.subr.mxu1 %v738_v0  ;;  %641 = vmatprep.subr.mxu0 %v738_v0  ;;  %v410_v9 = vld [vmem:[%s1102_s9 + $0x28] sm:$0xff]  ;;  %v409_v10 = vld [vmem:[%s1102_s9 + $0x20] sm:$0xff]  ;;  %v408_v11 = vld [vmem:[%s1102_s9 + $0x18] sm:$0xff] }
  0x17   :  { %613 = vmatpush3.msra.mxu1 %v128_v14  ;;  %642 = vmatpush3.msra.mxu0 %v225_v27  ;;  %v511_v12 = vld [vmem:[%s1103_s6] ss:$0 sm:$0xff] }
  0x18   :  { %614 = vmatprep.subr.mxu1 %v738_v0  ;;  %643 = vmatprep.subr.mxu0 %v738_v0  ;;  %v512_v20 = vld [vmem:[%s1104_s8] ss:$0 sm:$0xff] }
  0x19   :  { %615 = vmatpush3.msra.mxu1 %v127_v15  ;;  %644 = vmatpush3.msra.mxu0 %v224_v28  ;;  %v513_v25 = vld [vmem:[%s1105_s10] ss:$0 sm:$0xff] }
  0x1a   :  { %616 = vmatprep.subr.mxu1 %v738_v0  ;;  %645 = vmatprep.subr.mxu0 %v738_v0 }
  0x1b   :  { %617 = vmatpush3.msra.mxu1 %v126_v16  ;;  %646 = vmatpush3.msra.mxu0 %v223_v29 }
  0x1c   :  { %618 = vmatprep.subr.mxu1 %v738_v0  ;;  %647 = vmatprep.subr.mxu0 %v738_v0 }
  0x1d   :  { %619 = vmatpush3.msra.mxu1 %v125_v17  ;;  %648 = vmatpush3.msra.mxu0 %v222_v30  ;;  %v407_v17 = vld [vmem:[%s1102_s9 + $0x10] sm:$0xff] }
  0x1e   :  { %620 = vmatprep.subr.mxu1 %v738_v0  ;;  %649 = vmatprep.subr.mxu0 %v738_v0 }
  0x1f   :  { %621 = vmatpush3.msra.mxu1 %v124_v18  ;;  %650 = vmatpush3.msra.mxu0 %v221_v31  ;;  %v406_v18 = vld [vmem:[%s1102_s9 + $0x8] sm:$0xff] }
  0x20   :  { %622 = vmatprep.subr.mxu1 %v738_v0  ;;  %651 = vmatprep.subr.mxu0 %v738_v0 }
  0x21   :  { %623 = vmatpush3.msra.mxu1 %v123_v19  ;;  %652 = vmatpush3.msra.mxu0 %v220_v32  ;;  %v405_v19 = vld [vmem:[%s1102_s9] sm:$0xff] }
  0x22   :  { %662 = vmatprep.subr.mxu1 %v738_v0  ;;  %653 = vmatprep.subr.mxu0 %v738_v0 }
  0x23   :  { %654 = vmatpush3.msra.mxu0 %v219_v38 }
  0x24   :  { %655 = vmatprep.subr.mxu0 %v738_v0 }
  0x25   :  { %656 = vmatpush3.msra.mxu0 %v218_v39 }
  0x26   :  { %657 = vmatprep.subr.mxu0 %v738_v0 }
  0x27   :  { %658 = vmatpush3.msra.mxu0 %v217_v40 }
  0x28   :  { %697 = vmatprep.subr.mxu0 %v738_v0 }
  0xc5   :  { %v118_v34 = vpop.f32.mrf.mxu0 }
  0xc6   :  { %v119_v35 = vadd.f32 %v508_v33, %v118_v34 }
  0xc7   :  { %v591_v36 = vpop.f32.mrf.mxu0 }
  0xc8   :  { %v122_v37 = vmax.f32 %v119_v35, 0.0 }
  0xca   :  { %625 = vmatmul.mubr.f32.vlgmr.msra.gmra.mxu1 %v122_v37 }
  0xcb   :  { %694 = vmatprep.mubr.msk.f32.mxu1 %vm739_vm0, %v738_v0  ;;  %663 = vmatpush3.msra.mxu1 %v326_v41 }
  0xcc   :  { %664 = vmatprep.subr.mxu1 %v738_v0 }
  0xcd   :  { %665 = vmatpush3.msra.mxu1 %v325_v42 }
  0xce   :  { %666 = vmatprep.subr.mxu1 %v738_v0 }
  0xcf   :  { %667 = vmatpush3.msra.mxu1 %v324_v43 }
  0xd0   :  { %668 = vmatprep.subr.mxu1 %v738_v0 }
  0xd1   :  { %669 = vmatpush3.msra.mxu1 %v323_v44 }
  0xd2   :  { %670 = vmatprep.subr.mxu1 %v738_v0 }
  0xd3   :  { %671 = vmatpush3.msra.mxu1 %v322_v45 }
  0xd4   :  { %672 = vmatprep.subr.mxu1 %v738_v0 }
  0xd5   :  { %673 = vmatpush3.msra.mxu1 %v321_v46 }
  0xd6   :  { %674 = vmatprep.subr.mxu1 %v738_v0 }
  0xd7   :  { %675 = vmatpush3.msra.mxu1 %v320_v47 }
  0xd8   :  { %676 = vmatprep.subr.mxu1 %v738_v0 }
  0xd9   :  { %677 = vmatpush3.msra.mxu1 %v319_v48 }
  0xda   :  { %678 = vmatprep.subr.mxu1 %v738_v0 }
  0xdb   :  { %679 = vmatpush3.msra.mxu1 %v318_v49 }
  0xdc   :  { %680 = vmatprep.subr.mxu1 %v738_v0 }
  0xdd   :  { %681 = vmatpush3.msra.mxu1 %v317_v50 }
  0xde   :  { %682 = vmatprep.subr.mxu1 %v738_v0 }
  0xdf   :  { %683 = vmatpush3.msra.mxu1 %v316_v51 }
  0xe0   :  { %684 = vmatprep.subr.mxu1 %v738_v0 }
  0xe1   :  { %685 = vmatpush3.msra.mxu1 %v315_v52 }
  0xe2   :  { %686 = vmatprep.subr.mxu1 %v738_v0 }
  0xe3   :  { %687 = vmatpush3.msra.mxu1 %v314_v53 }
  0xe4   :  { %688 = vmatprep.subr.mxu1 %v738_v0 }
  0xe5   :  { %689 = vmatpush3.msra.mxu1 %v313_v59 }
  0xe6   :  { %690 = vmatprep.subr.mxu1 %v738_v0 }
  0xe7   :  { %691 = vmatpush3.msra.mxu1 %v312_v60 }
  0xe8   :  { %692 = vmatprep.subr.mxu1 %v738_v0 }
  0xe9   :  { %693 = vmatpush3.msra.mxu1 %v311_v61 }
 0x18a   :  { %v212_v55 = vpop.f32.mrf.mxu1 }
 0x18b   :  { %v213_v56 = vadd.f32 %v510_v54, %v212_v55 }
 0x18c   :  { %v626_v57 = vpop.f32.mrf.mxu1 }
 0x18d   :  { %v216_v58 = vmax.f32 %v213_v56, 0.0 }
 0x18f   :  { %660 = vmatmul.mubr.f32.vlgmr.msra.gmra.mxu0 %v216_v58 }
 0x190   :  { %729 = vmatprep.mubr.msk.f32.mxu0 %vm739_vm0, %v738_v0  ;;  %698 = vmatpush3.msra.mxu0 %v420_v62 }
 0x191   :  { %699 = vmatprep.subr.mxu0 %v738_v0 }
 0x192   :  { %700 = vmatpush3.msra.mxu0 %v419_v63 }
 0x193   :  { %701 = vmatprep.subr.mxu0 %v738_v0 }
 0x194   :  { %702 = vmatpush3.msra.mxu0 %v418_v1 }
 0x195   :  { %703 = vmatprep.subr.mxu0 %v738_v0 }
 0x196   :  { %704 = vmatpush3.msra.mxu0 %v417_v2 }
 0x197   :  { %705 = vmatprep.subr.mxu0 %v738_v0 }
 0x198   :  { %706 = vmatpush3.msra.mxu0 %v416_v3 }
 0x199   :  { %707 = vmatprep.subr.mxu0 %v738_v0 }
 0x19a   :  { %708 = vmatpush3.msra.mxu0 %v415_v4 }
 0x19b   :  { %709 = vmatprep.subr.mxu0 %v738_v0 }
 0x19c   :  { %710 = vmatpush3.msra.mxu0 %v414_v5 }
 0x19d   :  { %711 = vmatprep.subr.mxu0 %v738_v0 }
 0x19e   :  { %712 = vmatpush3.msra.mxu0 %v413_v6 }
 0x19f   :  { %713 = vmatprep.subr.mxu0 %v738_v0 }
 0x1a0   :  { %714 = vmatpush3.msra.mxu0 %v412_v7 }
 0x1a1   :  { %715 = vmatprep.subr.mxu0 %v738_v0 }
 0x1a2   :  { %716 = vmatpush3.msra.mxu0 %v411_v8 }
 0x1a3   :  { %717 = vmatprep.subr.mxu0 %v738_v0 }
 0x1a4   :  { %718 = vmatpush3.msra.mxu0 %v410_v9 }
 0x1a5   :  { %719 = vmatprep.subr.mxu0 %v738_v0 }
 0x1a6   :  { %720 = vmatpush3.msra.mxu0 %v409_v10 }
 0x1a7   :  { %721 = vmatprep.subr.mxu0 %v738_v0 }
 0x1a8   :  { %722 = vmatpush3.msra.mxu0 %v408_v11 }
 0x1a9   :  { %723 = vmatprep.subr.mxu0 %v738_v0 }
 0x1aa   :  { %724 = vmatpush3.msra.mxu0 %v407_v17 }
 0x1ab   :  { %725 = vmatprep.subr.mxu0 %v738_v0 }
 0x1ac   :  { %726 = vmatpush3.msra.mxu0 %v406_v18 }
 0x1ad   :  { %727 = vmatprep.subr.mxu0 %v738_v0 }
 0x1ae   :  { %728 = vmatpush3.msra.mxu0 %v405_v19 }
 0x24f   :  { %v306_v13 = vpop.f32.mrf.mxu0 }
 0x250   :  { %v307_v14 = vadd.f32 %v511_v12, %v306_v13 }
 0x251   :  { %v661_v15 = vpop.f32.mrf.mxu0 }
 0x252   :  { %v310_v16 = vmax.f32 %v307_v14, 0.0 }
 0x254   :  { %695 = vmatmul.mubr.f32.vlgmr.msra.gmra.mxu1 %v310_v16 }
 0x314   :  { %v400_v21 = vpop.f32.mrf.mxu1 }
 0x315   :  { %v401_v22 = vadd.f32 %v512_v20, %v400_v21 }
 0x316   :  { %v696_v23 = vpop.f32.mrf.mxu1 }
 0x317   :  { %v404_v24 = vmax.f32 %v401_v22, 0.0 }
 0x319   :  { %730 = vmatmul.mubr.f32.vlgmr.msra.gmra.mxu0 %v404_v24 }
 0x3d9   :  { %v494_v26 = vpop.f32.mrf.mxu0 }
 0x3da   :  { %v495_v0 = vadd.f32 %v513_v25, %v494_v26 }
 0x3db   :  { %v731_v27 = vpop.f32.mrf.mxu0 }
 0x3dc   :  { %v498_v28 = vsub.f32 0.0, %v495_v0 }
 0x3de   :  { %v499_v29 = vmul.f32 1.442695, %v498_v28 }
 0x3e0   :  { %734 = vpow2.f32 %v499_v29 }
 0x3ed   :  { %v735_v30 = vpop.eup %734 }
 0x3ee   :  { %v501_v31 = vadd.f32 1.0, %v735_v30 }
 0x3f0   :  { %736 = vrcp.f32 %v501_v31 }
 0x3fd   :  { %v737_v32 = vpop.eup %736 }
 0x3fe   :  { %503 = vst [vmem:[%s1106_s11] sm:$0xff] %v737_v32 }

</bundles_post_ra>
